<compile_context>
chip_gen: v5e
topology: v5e:2x2
jax: 0.10.0
libtpu: 0.0.40
codegen_flags: <defaults>
</compile_context>

<pallas_src>
import functools

import jax
import jax.numpy as jnp
from jax.experimental import pallas as pl
from jax.experimental.pallas import tpu as pltpu

LANE = 128           # TPU lane width (last dim)
SUB = 8              # f32 sublane granularity (batch-tile granularity)
SUB_P = 16           # bf16 sublane packing granularity (param blob rows)
DEFAULT_BLOCK_B = 512   # sweep 256 / 512 / 1024 for large-batch deployments


def _round_up(n, m):
    return ((n + m - 1) // m) * m


def _param_layout(input_size, hidden_size, output_size):
    """Static row/col layout of the packed bf16 parameter blob (Python ints).
    Every segment start is a multiple of 16 rows (bf16 sublane packing)."""
    k1p = _round_up(max(input_size, 1), SUB_P)
    hp = _round_up(hidden_size, LANE)
    op = _round_up(output_size, LANE)
    width = max(hp, op)
    ow1 = 0
    ob1 = ow1 + k1p
    ow2 = ob1 + SUB_P
    ob2 = ow2 + hp
    ow3 = ob2 + SUB_P
    ob3 = ow3 + hp
    rows = ob3 + SUB_P
    return dict(k1p=k1p, hp=hp, op=op, width=width,
                ow1=ow1, ob1=ob1, ow2=ow2, ob2=ob2, ow3=ow3, ob3=ob3,
                rows=rows)


def pack_params(params, input_size, hidden_size, output_size):
    """One-time packing (hoisted out of the per-call path): pre-transpose to
    (in, out), zero-pad to lane width, cast to bf16, and stack weights + biases
    into a single (rows, width) blob -> one VMEM-resident input."""
    L = _param_layout(input_size, hidden_size, output_size)
    w1, b1 = params["layer1"]   # (H, I), (H,)   PyTorch nn.Linear layout
    w2, b2 = params["layer2"]   # (H, H), (H,)
    w3, b3 = params["layer3"]   # (O, H), (O,)

    blob = jnp.zeros((L["rows"], L["width"]), jnp.bfloat16)
    blob = blob.at[L["ow1"]:L["ow1"] + input_size, :hidden_size].set(
        w1.T.astype(jnp.bfloat16))
    blob = blob.at[L["ob1"], :hidden_size].set(b1.astype(jnp.bfloat16))
    blob = blob.at[L["ow2"]:L["ow2"] + hidden_size, :hidden_size].set(
        w2.T.astype(jnp.bfloat16))
    blob = blob.at[L["ob2"], :hidden_size].set(b2.astype(jnp.bfloat16))
    blob = blob.at[L["ow3"]:L["ow3"] + hidden_size, :output_size].set(
        w3.T.astype(jnp.bfloat16))
    blob = blob.at[L["ob3"], :output_size].set(b3.astype(jnp.bfloat16))
    return blob


def mlp_kernel(x_ref, p_ref, o_ref, *, L, input_size, output_size):
    """Fused 3-layer MLP on one batch tile. Hidden activations are lane-dense
    (padded to 128 cols, padding stays exactly zero through the ReLUs); the
    final sigmoid + store touch only the live output columns."""
    hp, op = L["hp"], L["op"]
    x = x_ref[...].astype(jnp.bfloat16)                              # (TB, I)

    # Layer 1: Linear + ReLU   (bf16 operands, f32 MXU accumulation)
    w1 = p_ref[L["ow1"]:L["ow1"] + input_size, :hp]                  # (I, Hp)
    b1 = p_ref[L["ob1"]:L["ob1"] + 1, :hp].astype(jnp.float32)       # (1, Hp)
    h = jnp.maximum(
        jnp.dot(x, w1, preferred_element_type=jnp.float32) + b1, 0.0)

    # Layer 2: Linear + ReLU
    w2 = p_ref[L["ow2"]:L["ow2"] + hp, :hp]                          # (Hp, Hp)
    b2 = p_ref[L["ob2"]:L["ob2"] + 1, :hp].astype(jnp.float32)
    h = jnp.maximum(
        jnp.dot(h.astype(jnp.bfloat16), w2,
                preferred_element_type=jnp.float32) + b2, 0.0)

    # Layer 3: Linear + Sigmoid (sigmoid only on the live output columns)
    w3 = p_ref[L["ow3"]:L["ow3"] + hp, :op]                          # (Hp, Op)
    b3 = p_ref[L["ob3"]:L["ob3"] + 1, :op].astype(jnp.float32)
    z = jnp.dot(h.astype(jnp.bfloat16), w3,
                preferred_element_type=jnp.float32) + b3
    z = z[:, :output_size]                                           # (TB, O)
    sig = pl.reciprocal(1.0 + jnp.exp(-z), approx=True)              # EUP
    o_ref[...] = sig.astype(o_ref.dtype)


def _forward(x, packed, input_size, hidden_size, output_size):
    L = _param_layout(input_size, hidden_size, output_size)
    B = x.shape[0]

    # Batch tile: multiple of 8 sublanes, capped at DEFAULT_BLOCK_B, and also
    # capped at ceil(B/2) so large batches give >= 2 grid steps (v7x megacore).
    half = -(-B // 2)
    TB = max(SUB, min(DEFAULT_BLOCK_B, _round_up(half, SUB)))
    grid = (pl.cdiv(B, TB),)   # ragged last block handled by Pallas (no pad)

    kernel = functools.partial(mlp_kernel, L=L, input_size=input_size,
                               output_size=output_size)
    out = pl.pallas_call(
        kernel,
        # Narrow output: only the live columns ever hit HBM.
        out_shape=jax.ShapeDtypeStruct((B, output_size), jnp.float32),
        grid=grid,
        in_specs=[
            # x: tiled along batch (pipelined / double-buffered).
            pl.BlockSpec((TB, input_size), lambda i: (i, 0)),
            # packed params: VMEM-resident across all grid steps.
            pl.BlockSpec((L["rows"], L["width"]), lambda i: (0, 0)),
        ],
        out_specs=pl.BlockSpec((TB, output_size), lambda i: (i, 0)),
        compiler_params=pltpu.CompilerParams(
            dimension_semantics=("parallel",)),   # shards over 2 TCs on v7x
    )(x, packed)
    return out


# Static dims -> jit specializes once per configuration; per-call path is just
# the pallas_call (no transposes / pads / reshapes / slices).
three_layer_nn = jax.jit(_forward, static_argnums=(2, 3, 4))


def init_linear(key, in_dim, out_dim):
    """Deterministic init mimicking PyTorch nn.Linear default
    (U[-1/sqrt(fan_in), 1/sqrt(fan_in)])."""
    kw, kb = jax.random.split(key)
    bound = 1.0 / jnp.sqrt(jnp.float32(in_dim))
    w = jax.random.uniform(kw, (out_dim, in_dim), jnp.float32, -bound, bound)
    b = jax.random.uniform(kb, (out_dim,), jnp.float32, -bound, bound)
    return w, b


def reference_forward(x, params):
    w1, b1 = params["layer1"]
    w2, b2 = params["layer2"]
    w3, b3 = params["layer3"]
    h = jnp.maximum(x @ w1.T + b1, 0.0)
    h = jnp.maximum(h @ w2.T + b2, 0.0)
    return jax.nn.sigmoid(h @ w3.T + b3)


if __name__ == "__main__":
    input_size, hidden_size, output_size = 16, 32, 8
    batch = 8

    key = jax.random.PRNGKey(0)
    k_x, k1, k2, k3 = jax.random.split(key, 4)

    x = jax.random.normal(k_x, (batch, input_size), jnp.float32)
    params = {
        "layer1": init_linear(k1, input_size, hidden_size),
        "layer2": init_linear(k2, hidden_size, hidden_size),
        "layer3": init_linear(k3, hidden_size, output_size),
    }

    # Hoisted one-time parameter packing (transpose + pad + bf16 cast + concat).
    packed = jax.block_until_ready(
        pack_params(params, input_size, hidden_size, output_size))

    out = three_layer_nn(x, packed, input_size, hidden_size, output_size)
    out = jax.block_until_ready(out)

    ref = reference_forward(x, params)   # f32 reference
    assert out.shape == (batch, output_size)
    # bf16 matmul operands + approx reciprocal -> relaxed tolerance vs f32 ref.
    assert jnp.allclose(out, ref, atol=2e-2, rtol=2e-2), (
        float(jnp.max(jnp.abs(out - ref))))

    print("KERNEL_OK")
</pallas_src>

<mosaic_0001>
module attributes {stable_mosaic.version = 11 : i64} {
  func.func @mlp_kernel(%arg0: i32, %arg1: memref<8x16xf32, #tpu.memory_space<vmem>>, %arg2: memref<320x128xbf16, #tpu.memory_space<vmem>>, %arg3: memref<8x8xf32, #tpu.memory_space<vmem>>) attributes {dimension_semantics = [#tpu.dimension_semantics<parallel>], iteration_bounds = array<i64: 1>, scalar_prefetch = 0 : i64, scratch_operands = 0 : i64, tpu.core_type = #tpu.core_type<tc>, window_params = [{transform_indices = @transform_0, window_bounds = array<i64: 8, 16>}, {pipeline_mode = #tpu.pipeline_mode<synchronous>, transform_indices = @transform_1, window_bounds = array<i64: 320, 128>}, {transform_indices = @transform_2, window_bounds = array<i64: 8, 8>}]} {
    %c0 = arith.constant 0 : index
    %c0_0 = arith.constant 0 : index
    %0 = vector.load %arg1[%c0, %c0_0] : memref<8x16xf32, #tpu.memory_space<vmem>>, vector<8x16xf32>
    %1 = arith.truncf %0 : vector<8x16xf32> to vector<8x16xbf16>
    %c0_1 = arith.constant 0 : index
    %c0_2 = arith.constant 0 : index
    %2 = vector.load %arg2[%c0_1, %c0_2] : memref<320x128xbf16, #tpu.memory_space<vmem>>, vector<16x128xbf16>
    %c16 = arith.constant 16 : index
    %c0_3 = arith.constant 0 : index
    %3 = vector.load %arg2[%c16, %c0_3] : memref<320x128xbf16, #tpu.memory_space<vmem>>, vector<1x128xbf16>
    %4 = arith.extf %3 : vector<1x128xbf16> to vector<1x128xf32>
    %cst = arith.constant dense<0.000000e+00> : vector<8x128xf32>
    %5 = tpu.matmul %1, %2, %cst {dimension_numbers = #tpu.dot_dimension_numbers<[1], [0], [0], [1], [0, 0, 1, 1], [], []>} : vector<8x16xbf16>, vector<16x128xbf16>, vector<8x128xf32> -> vector<8x128xf32>
    %6 = vector.broadcast %4 : vector<1x128xf32> to vector<8x128xf32>
    %7 = arith.addf %5, %6 : vector<8x128xf32>
    %cst_4 = arith.constant 0.000000e+00 : f32
    %8 = vector.broadcast %cst_4 : f32 to vector<8x128xf32>
    %9 = arith.maximumf %7, %8 : vector<8x128xf32>
    %c32 = arith.constant 32 : index
    %c0_5 = arith.constant 0 : index
    %10 = vector.load %arg2[%c32, %c0_5] : memref<320x128xbf16, #tpu.memory_space<vmem>>, vector<128x128xbf16>
    %c160 = arith.constant 160 : index
    %c0_6 = arith.constant 0 : index
    %11 = vector.load %arg2[%c160, %c0_6] : memref<320x128xbf16, #tpu.memory_space<vmem>>, vector<1x128xbf16>
    %12 = arith.extf %11 : vector<1x128xbf16> to vector<1x128xf32>
    %13 = arith.truncf %9 : vector<8x128xf32> to vector<8x128xbf16>
    %cst_7 = arith.constant dense<0.000000e+00> : vector<8x128xf32>
    %14 = tpu.matmul %13, %10, %cst_7 {dimension_numbers = #tpu.dot_dimension_numbers<[1], [0], [0], [1], [0, 0, 1, 1], [], []>} : vector<8x128xbf16>, vector<128x128xbf16>, vector<8x128xf32> -> vector<8x128xf32>
    %15 = vector.broadcast %12 : vector<1x128xf32> to vector<8x128xf32>
    %16 = arith.addf %14, %15 : vector<8x128xf32>
    %cst_8 = arith.constant 0.000000e+00 : f32
    %17 = vector.broadcast %cst_8 : f32 to vector<8x128xf32>
    %18 = arith.maximumf %16, %17 : vector<8x128xf32>
    %c176 = arith.constant 176 : index
    %c0_9 = arith.constant 0 : index
    %19 = vector.load %arg2[%c176, %c0_9] : memref<320x128xbf16, #tpu.memory_space<vmem>>, vector<128x128xbf16>
    %c304 = arith.constant 304 : index
    %c0_10 = arith.constant 0 : index
    %20 = vector.load %arg2[%c304, %c0_10] : memref<320x128xbf16, #tpu.memory_space<vmem>>, vector<1x128xbf16>
    %21 = arith.extf %20 : vector<1x128xbf16> to vector<1x128xf32>
    %22 = arith.truncf %18 : vector<8x128xf32> to vector<8x128xbf16>
    %cst_11 = arith.constant dense<0.000000e+00> : vector<8x128xf32>
    %23 = tpu.matmul %22, %19, %cst_11 {dimension_numbers = #tpu.dot_dimension_numbers<[1], [0], [0], [1], [0, 0, 1, 1], [], []>} : vector<8x128xbf16>, vector<128x128xbf16>, vector<8x128xf32> -> vector<8x128xf32>
    %24 = vector.broadcast %21 : vector<1x128xf32> to vector<8x128xf32>
    %25 = arith.addf %23, %24 : vector<8x128xf32>
    %26 = vector.extract_strided_slice %25 {offsets = [0, 0], sizes = [8, 8], strides = [1, 1]} : vector<8x128xf32> to vector<8x8xf32>
    %cst_12 = arith.constant 0.000000e+00 : f32
    %27 = vector.broadcast %cst_12 : f32 to vector<8x8xf32>
    %28 = arith.subf %27, %26 : vector<8x8xf32>
    %29 = math.exp %28 : vector<8x8xf32>
    %cst_13 = arith.constant 1.000000e+00 : f32
    %30 = vector.broadcast %cst_13 : f32 to vector<8x8xf32>
    %31 = arith.addf %30, %29 : vector<8x8xf32>
    %32 = tpu.reciprocal %31 {approx = true} : vector<8x8xf32> -> vector<8x8xf32>
    %c0_14 = arith.constant 0 : index
    %c0_15 = arith.constant 0 : index
    %33 = vector.load %arg3[%c0_14, %c0_15] : memref<8x8xf32, #tpu.memory_space<vmem>>, vector<8x8xf32>
    tpu.vector_store %arg3[%c0_14, %c0_15], %32 {strides = array<i32>} : memref<8x8xf32, #tpu.memory_space<vmem>>, vector<8x8xf32>,
    return
  }
  func.func @transform_0(%arg0: i32) -> (i32, i32) {
    %c0_i32 = arith.constant 0 : i32
    %c0_i32_0 = arith.constant 0 : i32
    return %arg0, %c0_i32 : i32, i32
  }
  func.func @transform_1(%arg0: i32) -> (i32, i32) {
    %c0_i32 = arith.constant 0 : i32
    %c0_i32_0 = arith.constant 0 : i32
    %c0_i32_1 = arith.constant 0 : i32
    return %c0_i32, %c0_i32_0 : i32, i32
  }
  func.func @transform_2(%arg0: i32) -> (i32, i32) {
    %c0_i32 = arith.constant 0 : i32
    %c0_i32_0 = arith.constant 0 : i32
    return %arg0, %c0_i32 : i32, i32
  }
}

</mosaic_0001>

<bundles_post_ra>
// kernel: _forward.1
= control target key start
LH: loop header
LB: loop body
LE: loop exit
PB: predicated region body
PF: predicated region fallthrough
CT: control target
= control target key end

     0   :  { %7 = vsyncpa [#allocation3], 0  ;;  %s464_s0 = inlined_call_operand.hbm [shape: f32[8,16], index: 0, kind: input, shape index: {}]   ;;  %s465_s1 = inlined_call_operand.hbm [shape: bf16[320,128], index: 1, kind: input, shape index: {}]   ;;  %s466_s2 = inlined_call_operand.hbm [shape: f32[8,8], index: 2, kind: output, shape index: {}]  }
   0x1   :  { %8 = vsyncpa [#allocation6], 0 }
   0x2   :  { %9 = vsyncpa [#allocation4], 0  ;;  %s15_s11 = sshll.u32 %s464_s0, 4  ;;  %s435_s12 = smov [#allocation2]   ;;  %s16_s11 = int_to_ptr.hbm [resolvable:$true] %s15_s11 }
   0x3   :  { %s17_s13 = sshll.u32 %s435_s12, 4  ;;  %s25_s16 = sshll.u32 %s465_s1, 4  ;;  %s18_s13 = int_to_ptr.vmem [resolvable:$true] %s17_s13  ;;  %s26_s16 = int_to_ptr.hbm [resolvable:$true] %s25_s16 }
   0x4   :  { %20 = dma.hbm_to_vmem [thread:$0]  %s16_s11, 128, %s18_s13, [#allocation3]  }
   0x5   :  { %s436_s17 = smov [#allocation5]   ;;  %s437_s19 = smov 64  }
   0x6   :  { %s27_s18 = sshll.u32 %s436_s17, 4  ;;  %s438_s20 = smov 4   ;;  %s28_s18 = int_to_ptr.vmem [resolvable:$true] %s27_s18 }
   0x7   :  { %33 = dma.hbm_to_vmem [thread:$0]  %s26_s16, 2560, %s28_s18, [#allocation6], %s437_s19, %s437_s19, %s438_s20  }
   0x8   :  { %429 = dma.done.wait [#allocation3], 128  }
   0x9   :  { %430 = vsyncadd [#allocation3], 4294967168 }
   0xa   :  { %431 = dma.done.wait [#allocation6], 2560  }
   0xb   :  { %432 = vsyncadd [#allocation6], 4294964736  ;;  %v331_v0 = vld [vmem:[#allocation5] sm:$0xff]  ;;  %v43_v1 = vld [vmem:[#allocation2] sm:$0xff]  ;;  %vm56_vm0 = vcmask 130048   ;;  %s439_s0 = smov [#allocation7]  }
   0xc   :  { %v339_v2 = vld [vmem:[#allocation5 + $0x48] sm:$0xff]  ;;  %v44_v3 = vpack.c.bf16 %v43_v1, %v43_v1  ;;  %67 = vmatpush.bf16.msra.mxu0 %v331_v0  ;;  %v338_v4 = vld [vmem:[#allocation5 + $0x40] sm:$0xff]  ;;  %v337_v5 = vld [vmem:[#allocation5 + $0x38] sm:$0xff]  ;;  %s249_s1 = sshll.u32 %s439_s0, 4  ;;  %s251_s23 = sshll.u32 %s466_s2, 4  ;;  %vm242_vm1 = vcmask 64512   ;;  %s250_s1 = int_to_ptr.vmem [resolvable:$true] %s249_s1  ;;  %s252_s23 = int_to_ptr.hbm [resolvable:$true] %s251_s23 }
   0xd   :  { %142 = vmatpush.bf16.msra.mxu1 %v339_v2  ;;  %v336_v6 = vld [vmem:[#allocation5 + $0x30] sm:$0xff]  ;;  %v335_v7 = vld [vmem:[#allocation5 + $0x28] sm:$0xff]  ;;  %v334_v8 = vld [vmem:[#allocation5 + $0x20] sm:$0xff] }
   0xe   :  { %v333_v9 = vld [vmem:[#allocation5 + $0x18] sm:$0xff]  ;;  %v332_v10 = vld [vmem:[#allocation5 + $0x10] sm:$0xff]  ;;  %v346_v12 = vld [vmem:[#allocation5 + $0x88] sm:$0xff] }
   0xf   :  { %266 = vmatmul.msk.bf16.vlgmr.msra.gmra.mxu0 %vm56_vm0, %v44_v3  ;;  %v347_v11 = vld [vmem:[#allocation5 + $0x90] sm:$0xff]  ;;  %v345_v13 = vld [vmem:[#allocation5 + $0x80] sm:$0xff]  ;;  %v344_v14 = vld [vmem:[#allocation5 + $0x78] sm:$0xff] }
  0x10   :  { %224 = vmatpush.bf16.msra.mxu2 %v347_v11  ;;  %v47_v15 = vld [vmem:[#allocation5 + $0x8] sm:$0x1]  ;;  %v343_v16 = vld [vmem:[#allocation5 + $0x70] sm:$0xff]  ;;  %v341_v25 = vld [vmem:[#allocation5 + $0x60] sm:$0xff] }
  0x11   :  { %143 = vmatpush.bf16.msra.mxu1 %v338_v4  ;;  %v48_v17 = vunpack.c.l.bf16 %v47_v15  ;;  %v342_v18 = vld [vmem:[#allocation5 + $0x68] sm:$0xff]  ;;  %v340_v26 = vld [vmem:[#allocation5 + $0x58] sm:$0xff]  ;;  %v90_v27 = vld [vmem:[#allocation5 + $0x50] sm:$0x1] }
  0x12   :  { %v91_v28 = vunpack.c.l.bf16 %v90_v27  ;;  %v172_v35 = vld [vmem:[#allocation5 + $0x98] sm:$0x1] }
  0x13   :  { %v49_v19 = vperm.slane %v48_v17, 0  ;;  %v173_v36 = vunpack.c.l.bf16 %v172_v35 }
  0x14   :  { %225 = vmatpush.bf16.msra.mxu2 %v346_v12  ;;  %v93_v29 = vperm.slane %v91_v28, 0 }
  0x15   :  { %144 = vmatpush.bf16.msra.mxu1 %v337_v5  ;;  %v175_v37 = vperm.slane %v173_v36, 0 }
  0x18   :  { %226 = vmatpush.bf16.msra.mxu2 %v345_v13 }
  0x19   :  { %145 = vmatpush.bf16.msra.mxu1 %v336_v6 }
  0x1c   :  { %227 = vmatpush.bf16.msra.mxu2 %v344_v14 }
  0x1d   :  { %146 = vmatpush.bf16.msra.mxu1 %v335_v7 }
  0x20   :  { %228 = vmatpush.bf16.msra.mxu2 %v343_v16 }
  0x21   :  { %147 = vmatpush.bf16.msra.mxu1 %v334_v8 }
  0x24   :  { %229 = vmatpush.bf16.msra.mxu2 %v342_v18 }
  0x25   :  { %148 = vmatpush.bf16.msra.mxu1 %v333_v9 }
  0x28   :  { %230 = vmatpush.bf16.msra.mxu2 %v341_v25 }
  0x29   :  { %149 = vmatpush.bf16.msra.mxu1 %v332_v10 }
  0x2c   :  { %231 = vmatpush.bf16.msra.mxu2 %v340_v26 }
  0x8c   :  { %v69_v20 = vpop.f32.mrf.mxu0 }
  0x8d   :  { %v70_v21 = vadd.f32 %v69_v20, %v49_v19 }
  0x8f   :  { %v73_v22 = vmax.f32 %v70_v21, 0.0 }
  0x91   :  { %v92_v23 = vpack.c.bf16 %v73_v22, %v73_v22 }
  0x93   :  { %150 = vmatmul.bf16.vlgmr.msra.gmra.mxu1 %v92_v23 }
  0x94   :  { %v71_v24 = vpop.f32.mrf.mxu0 }
 0x110   :  { %v151_v30 = vpop.f32.mrf.mxu1 }
 0x111   :  { %v152_v31 = vadd.f32 %v151_v30, %v93_v29 }
 0x113   :  { %v155_v32 = vmax.f32 %v152_v31, 0.0 }
 0x115   :  { %v174_v33 = vpack.c.bf16 %v155_v32, %v155_v32 }
 0x117   :  { %232 = vmatmul.bf16.vlgmr.msra.gmra.mxu2 %v174_v33 }
 0x118   :  { %v153_v34 = vpop.f32.mrf.mxu1 }
 0x19a   :  { %v233_v38 = vpop.f32.mrf.mxu2 }
 0x19b   :  { %v234_v39 = vadd.f32 %v233_v38, %v175_v37 }
 0x19d   :  { %v237_v40 = vsub.f32 0.0, %v234_v39 }
 0x19f   :  { %v238_v41 = vmul.f32 1.442695, %v237_v40 }
 0x1a1   :  { %353 = vpow2.f32 %v238_v41 }
 0x1a2   :  { %v235_v42 = vpop.f32.mrf.mxu2 }
 0x1a7   :  { %v354_v43 = vpop.eup %353 }
 0x1a8   :  { %v240_v44 = vadd.f32 1.0, %v354_v43 }
 0x1aa   :  { %355 = vrcp.f32 %v240_v44 }
 0x1b0   :  { %v356_v45 = vpop.eup %355 }
 0x1b1   :  { %243 = vst.msk [vmem:[#allocation7] sm:$0xff] %vm242_vm1, %v356_v45 }
 0x1b2   :  { %254 = dma.vmem_to_hbm [thread:$0]  %s250_s1, 128, %s252_s23, [#allocation4]  }
 0x1b3   :  { %433 = dma.done.wait [#allocation4], 128  }
 0x1b4   :  { %434 = vsyncadd [#allocation4], 4294967168 }
 0x1b5   :  { %259 = vsyncpa [#allocation3], 1 }
 0x1b6   :  { %260 = vsyncpa [#allocation6], 1 }
 0x1b7   :  { %261 = vsyncpa [#allocation4], 1 }

</bundles_post_ra>
